<compile_context>
chip_gen: v5e
topology: v5e:2x2
jax: 0.10.0
libtpu: 0.0.40
codegen_flags: <defaults>
</compile_context>

<pallas_src>
import functools

import jax
import jax.numpy as jnp
from jax import lax
from jax.experimental import pallas as pl
from jax.experimental.pallas import tpu as pltpu

BOARD = 8
S = BOARD * BOARD          # 64 board squares
LANES = 2 * S              # 128 = fused FC contraction width
EPS = 1e-5                 # nn.BatchNorm2d default eps


def _round_up(a, m):
    return (a + m - 1) // m * m


# ---------------------------------------------------------------------------
# Fused 3-phase kernel.  grid = (3, n_tiles); both axes "arbitrary" (the phase
# axis is sequential and phases 0/1 carry cross-tile VMEM accumulators).
def fused_policy_head_kernel(g_ref, b_ref, x_ref, wbig_ref, fwt_ref, fcb_ref,
                             poss_ref, out_ref,
                             ycat_ref, p_ref, stats_ref, bn_ref, tot_ref,
                             *, inv_cnt):
    ph = pl.program_id(0)
    t = pl.program_id(1)

    # ---- Phase 0: 1x1 conv as one (TN, C*64) @ (C*64, 128) MXU matmul + stats.
    @pl.when(ph == 0)
    def _conv_and_stats():
        y = jnp.dot(x_ref[...], wbig_ref[...],
                    preferred_element_type=jnp.float32)            # (TN, 128)
        ycat_ref[t] = y                                            # stays in VMEM

        @pl.when(t == 0)
        def _():
            stats_ref[...] = jnp.zeros_like(stats_ref)

        stats_ref[0:1] = stats_ref[0:1] + jnp.sum(y, axis=0, keepdims=True)
        stats_ref[1:2] = stats_ref[1:2] + jnp.sum(y * y, axis=0, keepdims=True)

    # ---- Phase 1: fold BN once, then BN + ReLU + fused FC + exp + mask.
    @pl.when(ph == 1)
    def _bn_fc_exp():
        @pl.when(t == 0)
        def _fold_bn():
            lane = lax.broadcasted_iota(jnp.int32, (1, LANES), 1)
            is_c0 = (lane < S).astype(jnp.float32)                 # channel-0 lanes
            is_c1 = 1.0 - is_c0
            sums = stats_ref[0:1]                                  # (1, 128)
            sqs = stats_ref[1:2]
            s0 = jnp.sum(sums * is_c0, axis=-1, keepdims=True)     # (1, 1)
            s1 = jnp.sum(sums * is_c1, axis=-1, keepdims=True)
            q0 = jnp.sum(sqs * is_c0, axis=-1, keepdims=True)
            q1 = jnp.sum(sqs * is_c1, axis=-1, keepdims=True)
            m0 = s0 * inv_cnt
            m1 = s1 * inv_cnt
            v0 = q0 * inv_cnt - m0 * m0                            # E[y^2] - m^2
            v1 = q1 * inv_cnt - m1 * m1
            sc0 = g_ref[0] * lax.rsqrt(v0 + EPS)                   # folded BN scale
            sc1 = g_ref[1] * lax.rsqrt(v1 + EPS)
            sh0 = b_ref[0] - m0 * sc0                              # folded BN shift
            sh1 = b_ref[1] - m1 * sc1
            bn_ref[0:1] = jnp.where(lane < S, sc0, sc1)            # (1, 128)
            bn_ref[1:2] = jnp.where(lane < S, sh0, sh1)
            tot_ref[...] = jnp.zeros_like(tot_ref)

        y = ycat_ref[t]                                            # (TN, 128)
        h = jnp.maximum(y * bn_ref[0:1] + bn_ref[1:2], 0.0)        # BN + ReLU
        logits = (jnp.dot(h, fwt_ref[...], preferred_element_type=jnp.float32)
                  + fcb_ref[...])                                  # one K=128 MXU dot
        p = jnp.exp(logits) * poss_ref[...]                        # mask w/ `possible`
        p_ref[t] = p                                               # stays in VMEM
        tot_ref[...] = tot_ref[...] + jnp.sum(p, axis=0, keepdims=True)

    # ---- Phase 2: global-sum normalization p / sum(p).
    @pl.when(ph == 2)
    def _normalize():
        total = jnp.sum(tot_ref[...], axis=-1, keepdims=True)      # (1, 1)
        inv = pl.reciprocal(total, approx=True)                    # EUP slot
        inv = inv * (2.0 - total * inv)                            # one NR step
        out_ref[...] = p_ref[t] * inv


# ---------------------------------------------------------------------------
def policy_head_forward(x, possible, params):
    conv_w, conv_b, gamma, beta, fc_w, fc_b = params
    # conv_b is not passed to the kernel (cancelled by training-mode BN); the
    # reference below keeps it, which the allclose test verifies.
    del conv_b
    N, C, H, W = x.shape
    assert (H, W) == (BOARD, BOARD)
    K = C * S                                                      # conv contraction

    # Batch tiling: multiple-of-8 rows; x tile <= ~8 MiB; cap TN at 1024.
    tn_vmem = max(8, ((8 << 20) // (K * 4)) // 8 * 8)
    TN = min(1024, _round_up(N, 8), tn_vmem)
    N_pad = _round_up(N, TN)
    n_tiles = N_pad // TN

    # Whole-batch intermediates (ycat + p) stay resident in VMEM scratch.
    scratch_bytes = N_pad * (LANES + S) * 4
    # TODO(synk): for very large batches (> ~8 MiB of persistent scratch) fall
    # back to HBM-staged intermediates (3-call pipeline) instead of asserting.
    assert scratch_bytes <= (8 << 20), "batch too large for VMEM-resident fused kernel"

    # Layout-only glue: free contiguous reshapes, batch-axis zero pad, casts.
    x2d = jnp.pad(x.reshape(N, K).astype(jnp.float32), ((0, N_pad - N), (0, 0)))
    poss = jnp.pad(possible.reshape(N, S).astype(jnp.float32),
                   ((0, N_pad - N), (0, 0)))                       # zero mask on pad rows
    cw = conv_w.reshape(2, C).astype(jnp.float32)                  # (2, C)
    # W_big[c*64+s, o*64+s] = conv_w[o, c]: 1x1 conv as a single matmul.
    eye = jnp.eye(S, dtype=jnp.float32)
    wbig = jnp.einsum('oc,st->csot', cw, eye).reshape(K, LANES)    # (C*64, 128)
    g = gamma.astype(jnp.float32)
    b = beta.astype(jnp.float32)
    fwt = fc_w.T.astype(jnp.float32)                               # (128, 64)
    fcb = fc_b.reshape(1, S).astype(jnp.float32)

    smem = pl.BlockSpec(memory_space=pltpu.MemorySpace.SMEM)
    kernel = functools.partial(fused_policy_head_kernel, inv_cnt=1.0 / float(N * S))

    out = pl.pallas_call(
        kernel,
        grid=(3, n_tiles),
        in_specs=[
            smem,                                                  # gamma
            smem,                                                  # beta
            pl.BlockSpec((TN, K), lambda ph, t: (jnp.where(ph == 0, t, 0), 0)),
            pl.BlockSpec((K, LANES), lambda ph, t: (0, 0)),        # W_big (const)
            pl.BlockSpec((LANES, S), lambda ph, t: (0, 0)),        # fc_w.T (const)
            pl.BlockSpec((1, S), lambda ph, t: (0, 0)),            # fc_b   (const)
            pl.BlockSpec((TN, S), lambda ph, t: (jnp.where(ph == 1, t, 0), 0)),
        ],
        out_specs=pl.BlockSpec((TN, S), lambda ph, t: (jnp.where(ph == 2, t, 0), 0)),
        out_shape=jax.ShapeDtypeStruct((N_pad, S), jnp.float32),
        scratch_shapes=[
            pltpu.VMEM((n_tiles, TN, LANES), jnp.float32),         # ycat (conv out)
            pltpu.VMEM((n_tiles, TN, S), jnp.float32),             # p (unnormalized)
            pltpu.VMEM((2, LANES), jnp.float32),                   # [sum; sumsq] lane partials
            pltpu.VMEM((2, LANES), jnp.float32),                   # folded BN [scale; shift]
            pltpu.VMEM((1, S), jnp.float32),                       # exp-sum lane partials
        ],
        compiler_params=pltpu.CompilerParams(
            dimension_semantics=("arbitrary", "arbitrary")),
    )(g, b, x2d, wbig, fwt, fcb, poss)

    return out[:N].reshape(N, BOARD, BOARD)


# ---------------------------------------------------------------------------
def policy_head_reference(x, possible, params):
    """Pure-JAX reference mirroring the PyTorch forward (training-mode BN)."""
    conv_w, conv_b, gamma, beta, fc_w, fc_b = params
    N = x.shape[0]
    y = jnp.einsum('oc,nchw->nohw', conv_w.reshape(2, -1), x) + conv_b[None, :, None, None]
    m = jnp.mean(y, axis=(0, 2, 3), keepdims=True)
    v = jnp.mean((y - m) ** 2, axis=(0, 2, 3), keepdims=True)
    y = (y - m) / jnp.sqrt(v + EPS) * gamma[None, :, None, None] + beta[None, :, None, None]
    y = jnp.maximum(y, 0.0)
    flat = y.reshape(N, 2 * S)
    logits = flat @ fc_w.T + fc_b
    p = jnp.exp(logits).reshape(N, BOARD, BOARD) * possible
    return p / jnp.sum(p)


if __name__ == "__main__":
    key = jax.random.PRNGKey(0)
    k1, k2, k3, k4, k5, k6, k7, k8 = jax.random.split(key, 8)
    N, C = 2, 4                                            # batch=2, in_channels=4, 8x8 board

    # Deterministic synthetic parameters (shapes from PolicyHead.__init__).
    conv_w = 0.2 * jax.random.normal(k1, (2, C, 1, 1), jnp.float32)     # Conv2d(C, 2, 1)
    conv_b = 0.1 * jax.random.normal(k2, (2,), jnp.float32)
    gamma = 1.0 + 0.1 * jax.random.normal(k3, (2,), jnp.float32)        # BatchNorm2d(2)
    beta = 0.1 * jax.random.normal(k4, (2,), jnp.float32)
    fc_w = 0.1 * jax.random.normal(k5, (S, 2 * S), jnp.float32)         # Linear(128, 64)
    fc_b = 0.05 * jax.random.normal(k6, (S,), jnp.float32)
    params = (conv_w, conv_b, gamma, beta, fc_w, fc_b)

    x = jax.random.normal(k7, (N, C, BOARD, BOARD), jnp.float32)        # NCHW input
    possible = (jax.random.uniform(k8, (N, BOARD, BOARD)) < 0.6).astype(jnp.float32)
    possible = possible.at[0, 0, 0].set(1.0)               # guarantee a nonzero mask

    out = policy_head_forward(x, possible, params)
    out = jax.block_until_ready(out)

    ref = policy_head_reference(x, possible, params)
    assert out.shape == (N, BOARD, BOARD)
    assert jnp.allclose(out, ref, rtol=1e-2, atol=1e-5)
    print("KERNEL_OK")
</pallas_src>

<mosaic_0001>
module attributes {stable_mosaic.version = 11 : i64} {
  func.func @fused_policy_head_kernel(%arg0: i32, %arg1: i32, %arg2: memref<2xf32, #tpu.memory_space<smem>>, %arg3: memref<2xf32, #tpu.memory_space<smem>>, %arg4: memref<8x256xf32, #tpu.memory_space<vmem>>, %arg5: memref<256x128xf32, #tpu.memory_space<vmem>>, %arg6: memref<128x64xf32, #tpu.memory_space<vmem>>, %arg7: memref<1x64xf32, #tpu.memory_space<vmem>>, %arg8: memref<8x64xf32, #tpu.memory_space<vmem>>, %arg9: memref<8x64xf32, #tpu.memory_space<vmem>>, %arg10: memref<1x8x128xf32, #tpu.memory_space<vmem>>, %arg11: memref<1x8x64xf32, #tpu.memory_space<vmem>>, %arg12: memref<2x128xf32, #tpu.memory_space<vmem>>, %arg13: memref<2x128xf32, #tpu.memory_space<vmem>>, %arg14: memref<1x64xf32, #tpu.memory_space<vmem>>) attributes {dimension_semantics = [#tpu.dimension_semantics<arbitrary>, #tpu.dimension_semantics<arbitrary>], iteration_bounds = array<i64: 3, 1>, scalar_prefetch = 0 : i64, scratch_operands = 5 : i64, tpu.core_type = #tpu.core_type<tc>, window_params = [{transform_indices = @transform_0, window_bounds = array<i64: 2>}, {transform_indices = @transform_1, window_bounds = array<i64: 2>}, {transform_indices = @transform_2, window_bounds = array<i64: 8, 256>}, {pipeline_mode = #tpu.pipeline_mode<synchronous>, transform_indices = @transform_3, window_bounds = array<i64: 256, 128>}, {pipeline_mode = #tpu.pipeline_mode<synchronous>, transform_indices = @transform_4, window_bounds = array<i64: 128, 64>}, {pipeline_mode = #tpu.pipeline_mode<synchronous>, transform_indices = @transform_5, window_bounds = array<i64: 1, 64>}, {transform_indices = @transform_6, window_bounds = array<i64: 8, 64>}, {transform_indices = @transform_7, window_bounds = array<i64: 8, 64>}]} {
    %c0_i32 = arith.constant 0 : i32
    %0 = arith.cmpi eq, %arg0, %c0_i32 : i32
    %1 = arith.extui %0 : i1 to i32
    %c0_i32_0 = arith.constant 0 : i32
    %2 = arith.cmpi ne, %1, %c0_i32_0 : i32
    scf.if %2 {
      %c0 = arith.constant 0 : index
      %c0_3 = arith.constant 0 : index
      %9 = vector.load %arg4[%c0, %c0_3] : memref<8x256xf32, #tpu.memory_space<vmem>>, vector<8x256xf32>
      %c0_4 = arith.constant 0 : index
      %c0_5 = arith.constant 0 : index
      %10 = vector.load %arg5[%c0_4, %c0_5] : memref<256x128xf32, #tpu.memory_space<vmem>>, vector<256x128xf32>
      %cst = arith.constant dense<0.000000e+00> : vector<8x128xf32>
      %11 = tpu.matmul %9, %10, %cst {dimension_numbers = #tpu.dot_dimension_numbers<[1], [0], [0], [1], [0, 0, 1, 1], [], []>} : vector<8x256xf32>, vector<256x128xf32>, vector<8x128xf32> -> vector<8x128xf32>
      %12 = arith.index_cast %arg1 : i32 to index
      %c0_6 = arith.constant 0 : index
      %c0_7 = arith.constant 0 : index
      %13 = vector.load %arg10[%12, %c0_6, %c0_7] : memref<1x8x128xf32, #tpu.memory_space<vmem>>, vector<1x8x128xf32>
      %14 = vector.shape_cast %13 : vector<1x8x128xf32> to vector<8x128xf32>
      %15 = vector.shape_cast %11 : vector<8x128xf32> to vector<1x8x128xf32>
      tpu.vector_store %arg10[%12, %c0_6, %c0_7], %15 {strides = array<i32>} : memref<1x8x128xf32, #tpu.memory_space<vmem>>, vector<1x8x128xf32>,
      %c0_i32_8 = arith.constant 0 : i32
      %16 = arith.cmpi eq, %arg1, %c0_i32_8 : i32
      %17 = arith.extui %16 : i1 to i32
      %c0_i32_9 = arith.constant 0 : i32
      %18 = arith.cmpi ne, %17, %c0_i32_9 : i32
      scf.if %18 {
        %cst_19 = arith.constant 0.000000e+00 : f32
        %30 = vector.broadcast %cst_19 : f32 to vector<2x128xf32>
        %c0_20 = arith.constant 0 : index
        %c0_21 = arith.constant 0 : index
        %31 = vector.load %arg12[%c0_20, %c0_21] : memref<2x128xf32, #tpu.memory_space<vmem>>, vector<2x128xf32>
        tpu.vector_store %arg12[%c0_20, %c0_21], %30 {strides = array<i32>} : memref<2x128xf32, #tpu.memory_space<vmem>>, vector<2x128xf32>,
      } else {
      }
      %c0_10 = arith.constant 0 : index
      %c0_11 = arith.constant 0 : index
      %19 = vector.load %arg12[%c0_10, %c0_11] : memref<2x128xf32, #tpu.memory_space<vmem>>, vector<1x128xf32>
      %cst_12 = arith.constant dense<0.000000e+00> : vector<128xf32>
      %20 = vector.multi_reduction <add>, %11, %cst_12 [0] : vector<8x128xf32> to vector<128xf32>
      %21 = vector.shape_cast %20 : vector<128xf32> to vector<1x128xf32>
      %22 = arith.addf %19, %21 : vector<1x128xf32>
      %c0_13 = arith.constant 0 : index
      %c0_14 = arith.constant 0 : index
      %23 = vector.load %arg12[%c0_13, %c0_14] : memref<2x128xf32, #tpu.memory_space<vmem>>, vector<1x128xf32>
      tpu.vector_store %arg12[%c0_13, %c0_14], %22 {strides = array<i32>} : memref<2x128xf32, #tpu.memory_space<vmem>>, vector<1x128xf32>,
      %c1 = arith.constant 1 : index
      %c0_15 = arith.constant 0 : index
      %24 = vector.load %arg12[%c1, %c0_15] : memref<2x128xf32, #tpu.memory_space<vmem>>, vector<1x128xf32>
      %25 = arith.mulf %11, %11 : vector<8x128xf32>
      %cst_16 = arith.constant dense<0.000000e+00> : vector<128xf32>
      %26 = vector.multi_reduction <add>, %25, %cst_16 [0] : vector<8x128xf32> to vector<128xf32>
      %27 = vector.shape_cast %26 : vector<128xf32> to vector<1x128xf32>
      %28 = arith.addf %24, %27 : vector<1x128xf32>
      %c1_17 = arith.constant 1 : index
      %c0_18 = arith.constant 0 : index
      %29 = vector.load %arg12[%c1_17, %c0_18] : memref<2x128xf32, #tpu.memory_space<vmem>>, vector<1x128xf32>
      tpu.vector_store %arg12[%c1_17, %c0_18], %28 {strides = array<i32>} : memref<2x128xf32, #tpu.memory_space<vmem>>, vector<1x128xf32>,
    } else {
    }
    %c1_i32 = arith.constant 1 : i32
    %3 = arith.cmpi eq, %arg0, %c1_i32 : i32
    %4 = arith.extui %3 : i1 to i32
    %c0_i32_1 = arith.constant 0 : i32
    %5 = arith.cmpi ne, %4, %c0_i32_1 : i32
    scf.if %5 {
      %c0_i32_3 = arith.constant 0 : i32
      %9 = arith.cmpi eq, %arg1, %c0_i32_3 : i32
      %10 = arith.extui %9 : i1 to i32
      %c0_i32_4 = arith.constant 0 : i32
      %11 = arith.cmpi ne, %10, %c0_i32_4 : i32
      scf.if %11 {
        %40 = tpu.iota {dimensions = array<i32: 1>} : vector<1x128xi32>
        %c64_i32 = arith.constant 64 : i32
        %41 = vector.broadcast %c64_i32 : i32 to vector<1x128xi32>
        %42 = arith.cmpi slt, %40, %41 : vector<1x128xi32>
        %43 = arith.extui %42 : vector<1x128xi1> to vector<1x128xi32>
        %44 = arith.sitofp %43 : vector<1x128xi32> to vector<1x128xf32>
        %cst_23 = arith.constant 1.000000e+00 : f32
        %45 = vector.broadcast %cst_23 : f32 to vector<1x128xf32>
        %46 = arith.subf %45, %44 : vector<1x128xf32>
        %c0_24 = arith.constant 0 : index
        %c0_25 = arith.constant 0 : index
        %47 = vector.load %arg12[%c0_24, %c0_25] : memref<2x128xf32, #tpu.memory_space<vmem>>, vector<1x128xf32>
        %c1_26 = arith.constant 1 : index
        %c0_27 = arith.constant 0 : index
        %48 = vector.load %arg12[%c1_26, %c0_27] : memref<2x128xf32, #tpu.memory_space<vmem>>, vector<1x128xf32>
        %49 = arith.mulf %47, %44 : vector<1x128xf32>
        %cst_28 = arith.constant dense<0.000000e+00> : vector<1xf32>
        %50 = vector.multi_reduction <add>, %49, %cst_28 [1] : vector<1x128xf32> to vector<1xf32>
        %51 = vector.shape_cast %50 : vector<1xf32> to vector<1x1xf32>
        %52 = arith.mulf %47, %46 : vector<1x128xf32>
        %cst_29 = arith.constant dense<0.000000e+00> : vector<1xf32>
        %53 = vector.multi_reduction <add>, %52, %cst_29 [1] : vector<1x128xf32> to vector<1xf32>
        %54 = vector.shape_cast %53 : vector<1xf32> to vector<1x1xf32>
        %55 = arith.mulf %48, %44 : vector<1x128xf32>
        %cst_30 = arith.constant dense<0.000000e+00> : vector<1xf32>
        %56 = vector.multi_reduction <add>, %55, %cst_30 [1] : vector<1x128xf32> to vector<1xf32>
        %57 = vector.shape_cast %56 : vector<1xf32> to vector<1x1xf32>
        %58 = arith.mulf %48, %46 : vector<1x128xf32>
        %cst_31 = arith.constant dense<0.000000e+00> : vector<1xf32>
        %59 = vector.multi_reduction <add>, %58, %cst_31 [1] : vector<1x128xf32> to vector<1xf32>
        %60 = vector.shape_cast %59 : vector<1xf32> to vector<1x1xf32>
        %cst_32 = arith.constant 7.812500e-03 : f32
        %61 = vector.broadcast %cst_32 : f32 to vector<1x1xf32>
        %62 = arith.mulf %51, %61 : vector<1x1xf32>
        %cst_33 = arith.constant 7.812500e-03 : f32
        %63 = vector.broadcast %cst_33 : f32 to vector<1x1xf32>
        %64 = arith.mulf %54, %63 : vector<1x1xf32>
        %cst_34 = arith.constant 7.812500e-03 : f32
        %65 = vector.broadcast %cst_34 : f32 to vector<1x1xf32>
        %66 = arith.mulf %57, %65 : vector<1x1xf32>
        %67 = arith.mulf %62, %62 : vector<1x1xf32>
        %68 = arith.subf %66, %67 : vector<1x1xf32>
        %cst_35 = arith.constant 7.812500e-03 : f32
        %69 = vector.broadcast %cst_35 : f32 to vector<1x1xf32>
        %70 = arith.mulf %60, %69 : vector<1x1xf32>
        %71 = arith.mulf %64, %64 : vector<1x1xf32>
        %72 = arith.subf %70, %71 : vector<1x1xf32>
        %c0_36 = arith.constant 0 : index
        %73 = memref.load %arg2[%c0_36] : memref<2xf32, #tpu.memory_space<smem>>
        %cst_37 = arith.constant 9.99999974E-6 : f32
        %74 = vector.broadcast %cst_37 : f32 to vector<1x1xf32>
        %75 = arith.addf %68, %74 : vector<1x1xf32>
        %76 = math.rsqrt %75 : vector<1x1xf32>
        %77 = vector.broadcast %73 : f32 to vector<1x1xf32>
        %78 = arith.mulf %77, %76 : vector<1x1xf32>
        %c1_38 = arith.constant 1 : index
        %79 = memref.load %arg2[%c1_38] : memref<2xf32, #tpu.memory_space<smem>>
        %cst_39 = arith.constant 9.99999974E-6 : f32
        %80 = vector.broadcast %cst_39 : f32 to vector<1x1xf32>
        %81 = arith.addf %72, %80 : vector<1x1xf32>
        %82 = math.rsqrt %81 : vector<1x1xf32>
        %83 = vector.broadcast %79 : f32 to vector<1x1xf32>
        %84 = arith.mulf %83, %82 : vector<1x1xf32>
        %c0_40 = arith.constant 0 : index
        %85 = memref.load %arg3[%c0_40] : memref<2xf32, #tpu.memory_space<smem>>
        %86 = arith.mulf %62, %78 : vector<1x1xf32>
        %87 = vector.broadcast %85 : f32 to vector<1x1xf32>
        %88 = arith.subf %87, %86 : vector<1x1xf32>
        %c1_41 = arith.constant 1 : index
        %89 = memref.load %arg3[%c1_41] : memref<2xf32, #tpu.memory_space<smem>>
        %90 = arith.mulf %64, %84 : vector<1x1xf32>
        %91 = vector.broadcast %89 : f32 to vector<1x1xf32>
        %92 = arith.subf %91, %90 : vector<1x1xf32>
        %c64_i32_42 = arith.constant 64 : i32
        %93 = vector.broadcast %c64_i32_42 : i32 to vector<1x128xi32>
        %94 = arith.cmpi slt, %40, %93 : vector<1x128xi32>
        %95 = vector.shape_cast %78 : vector<1x1xf32> to vector<1x1xf32>
        %96 = vector.broadcast %95 : vector<1x1xf32> to vector<1x128xf32>
        %97 = vector.shape_cast %84 : vector<1x1xf32> to vector<1x1xf32>
        %98 = vector.broadcast %97 : vector<1x1xf32> to vector<1x128xf32>
        %99 = arith.select %94, %96, %98 : vector<1x128xi1>, vector<1x128xf32>
        %c0_43 = arith.constant 0 : index
        %c0_44 = arith.constant 0 : index
        %100 = vector.load %arg13[%c0_43, %c0_44] : memref<2x128xf32, #tpu.memory_space<vmem>>, vector<1x128xf32>
        tpu.vector_store %arg13[%c0_43, %c0_44], %99 {strides = array<i32>} : memref<2x128xf32, #tpu.memory_space<vmem>>, vector<1x128xf32>,
        %c64_i32_45 = arith.constant 64 : i32
        %101 = vector.broadcast %c64_i32_45 : i32 to vector<1x128xi32>
        %102 = arith.cmpi slt, %40, %101 : vector<1x128xi32>
        %103 = vector.shape_cast %88 : vector<1x1xf32> to vector<1x1xf32>
        %104 = vector.broadcast %103 : vector<1x1xf32> to vector<1x128xf32>
        %105 = vector.shape_cast %92 : vector<1x1xf32> to vector<1x1xf32>
        %106 = vector.broadcast %105 : vector<1x1xf32> to vector<1x128xf32>
        %107 = arith.select %102, %104, %106 : vector<1x128xi1>, vector<1x128xf32>
        %c1_46 = arith.constant 1 : index
        %c0_47 = arith.constant 0 : index
        %108 = vector.load %arg13[%c1_46, %c0_47] : memref<2x128xf32, #tpu.memory_space<vmem>>, vector<1x128xf32>
        tpu.vector_store %arg13[%c1_46, %c0_47], %107 {strides = array<i32>} : memref<2x128xf32, #tpu.memory_space<vmem>>, vector<1x128xf32>,
        %cst_48 = arith.constant 0.000000e+00 : f32
        %109 = vector.broadcast %cst_48 : f32 to vector<1x64xf32>
        %c0_49 = arith.constant 0 : index
        %c0_50 = arith.constant 0 : index
        %110 = vector.load %arg14[%c0_49, %c0_50] : memref<1x64xf32, #tpu.memory_space<vmem>>, vector<1x64xf32>
        tpu.vector_store %arg14[%c0_49, %c0_50], %109 {strides = array<i32>} : memref<1x64xf32, #tpu.memory_space<vmem>>, vector<1x64xf32>,
      } else {
      }
      %12 = arith.index_cast %arg1 : i32 to index
      %c0 = arith.constant 0 : index
      %c0_5 = arith.constant 0 : index
      %13 = vector.load %arg10[%12, %c0, %c0_5] : memref<1x8x128xf32, #tpu.memory_space<vmem>>, vector<1x8x128xf32>
      %14 = vector.shape_cast %13 : vector<1x8x128xf32> to vector<8x128xf32>
      %c0_6 = arith.constant 0 : index
      %c0_7 = arith.constant 0 : index
      %15 = vector.load %arg13[%c0_6, %c0_7] : memref<2x128xf32, #tpu.memory_space<vmem>>, vector<1x128xf32>
      %16 = vector.broadcast %15 : vector<1x128xf32> to vector<8x128xf32>
      %17 = arith.mulf %14, %16 : vector<8x128xf32>
      %c1 = arith.constant 1 : index
      %c0_8 = arith.constant 0 : index
      %18 = vector.load %arg13[%c1, %c0_8] : memref<2x128xf32, #tpu.memory_space<vmem>>, vector<1x128xf32>
      %19 = vector.broadcast %18 : vector<1x128xf32> to vector<8x128xf32>
      %20 = arith.addf %17, %19 : vector<8x128xf32>
      %cst = arith.constant 0.000000e+00 : f32
      %21 = vector.broadcast %cst : f32 to vector<8x128xf32>
      %22 = arith.maximumf %20, %21 : vector<8x128xf32>
      %c0_9 = arith.constant 0 : index
      %c0_10 = arith.constant 0 : index
      %23 = vector.load %arg6[%c0_9, %c0_10] : memref<128x64xf32, #tpu.memory_space<vmem>>, vector<128x64xf32>
      %cst_11 = arith.constant dense<0.000000e+00> : vector<8x64xf32>
      %24 = tpu.matmul %22, %23, %cst_11 {dimension_numbers = #tpu.dot_dimension_numbers<[1], [0], [0], [1], [0, 0, 1, 1], [], []>} : vector<8x128xf32>, vector<128x64xf32>, vector<8x64xf32> -> vector<8x64xf32>
      %c0_12 = arith.constant 0 : index
      %c0_13 = arith.constant 0 : index
      %25 = vector.load %arg7[%c0_12, %c0_13] : memref<1x64xf32, #tpu.memory_space<vmem>>, vector<1x64xf32>
      %26 = vector.broadcast %25 : vector<1x64xf32> to vector<8x64xf32>
      %27 = arith.addf %24, %26 : vector<8x64xf32>
      %28 = math.exp %27 : vector<8x64xf32>
      %c0_14 = arith.constant 0 : index
      %c0_15 = arith.constant 0 : index
      %29 = vector.load %arg8[%c0_14, %c0_15] : memref<8x64xf32, #tpu.memory_space<vmem>>, vector<8x64xf32>
      %30 = arith.mulf %28, %29 : vector<8x64xf32>
      %31 = arith.index_cast %arg1 : i32 to index
      %c0_16 = arith.constant 0 : index
      %c0_17 = arith.constant 0 : index
      %32 = vector.load %arg11[%31, %c0_16, %c0_17] : memref<1x8x64xf32, #tpu.memory_space<vmem>>, vector<1x8x64xf32>
      %33 = vector.shape_cast %32 : vector<1x8x64xf32> to vector<8x64xf32>
      %34 = vector.shape_cast %30 : vector<8x64xf32> to vector<1x8x64xf32>
      tpu.vector_store %arg11[%31, %c0_16, %c0_17], %34 {strides = array<i32>} : memref<1x8x64xf32, #tpu.memory_space<vmem>>, vector<1x8x64xf32>,
      %c0_18 = arith.constant 0 : index
      %c0_19 = arith.constant 0 : index
      %35 = vector.load %arg14[%c0_18, %c0_19] : memref<1x64xf32, #tpu.memory_space<vmem>>, vector<1x64xf32>
      %cst_20 = arith.constant dense<0.000000e+00> : vector<64xf32>
      %36 = vector.multi_reduction <add>, %30, %cst_20 [0] : vector<8x64xf32> to vector<64xf32>
      %37 = vector.shape_cast %36 : vector<64xf32> to vector<1x64xf32>
      %38 = arith.addf %35, %37 : vector<1x64xf32>
      %c0_21 = arith.constant 0 : index
      %c0_22 = arith.constant 0 : index
      %39 = vector.load %arg14[%c0_21, %c0_22] : memref<1x64xf32, #tpu.memory_space<vmem>>, vector<1x64xf32>
      tpu.vector_store %arg14[%c0_21, %c0_22], %38 {strides = array<i32>} : memref<1x64xf32, #tpu.memory_space<vmem>>, vector<1x64xf32>,
    } else {
    }
    %c2_i32 = arith.constant 2 : i32
    %6 = arith.cmpi eq, %arg0, %c2_i32 : i32
    %7 = arith.extui %6 : i1 to i32
    %c0_i32_2 = arith.constant 0 : i32
    %8 = arith.cmpi ne, %7, %c0_i32_2 : i32
    scf.if %8 {
      %c0 = arith.constant 0 : index
      %c0_3 = arith.constant 0 : index
      %9 = vector.load %arg14[%c0, %c0_3] : memref<1x64xf32, #tpu.memory_space<vmem>>, vector<1x64xf32>
      %cst = arith.constant dense<0.000000e+00> : vector<1xf32>
      %10 = vector.multi_reduction <add>, %9, %cst [1] : vector<1x64xf32> to vector<1xf32>
      %11 = vector.shape_cast %10 : vector<1xf32> to vector<1x1xf32>
      %12 = tpu.reciprocal %11 {approx = true} : vector<1x1xf32> -> vector<1x1xf32>
      %13 = arith.mulf %11, %12 : vector<1x1xf32>
      %cst_4 = arith.constant 2.000000e+00 : f32
      %14 = vector.broadcast %cst_4 : f32 to vector<1x1xf32>
      %15 = arith.subf %14, %13 : vector<1x1xf32>
      %16 = arith.mulf %12, %15 : vector<1x1xf32>
      %17 = arith.index_cast %arg1 : i32 to index
      %c0_5 = arith.constant 0 : index
      %c0_6 = arith.constant 0 : index
      %18 = vector.load %arg11[%17, %c0_5, %c0_6] : memref<1x8x64xf32, #tpu.memory_space<vmem>>, vector<1x8x64xf32>
      %19 = vector.shape_cast %18 : vector<1x8x64xf32> to vector<8x64xf32>
      %20 = vector.broadcast %16 : vector<1x1xf32> to vector<8x64xf32>
      %21 = arith.mulf %19, %20 : vector<8x64xf32>
      %c0_7 = arith.constant 0 : index
      %c0_8 = arith.constant 0 : index
      %22 = vector.load %arg9[%c0_7, %c0_8] : memref<8x64xf32, #tpu.memory_space<vmem>>, vector<8x64xf32>
      tpu.vector_store %arg9[%c0_7, %c0_8], %21 {strides = array<i32>} : memref<8x64xf32, #tpu.memory_space<vmem>>, vector<8x64xf32>,
    } else {
    }
    return
  }
  func.func @transform_0(%arg0: i32, %arg1: i32) -> i32 {
    %c0_i32 = arith.constant 0 : i32
    %c0_i32_0 = arith.constant 0 : i32
    return %c0_i32 : i32
  }
  func.func @transform_1(%arg0: i32, %arg1: i32) -> i32 {
    %c0_i32 = arith.constant 0 : i32
    %c0_i32_0 = arith.constant 0 : i32
    return %c0_i32 : i32
  }
  func.func @transform_2(%arg0: i32, %arg1: i32) -> (i32, i32) {
    %c0_i32 = arith.constant 0 : i32
    %0 = arith.cmpi eq, %arg0, %c0_i32 : i32
    %c0_i32_0 = arith.constant 0 : i32
    %1 = arith.select %0, %arg1, %c0_i32_0 : i32
    %c0_i32_1 = arith.constant 0 : i32
    %c0_i32_2 = arith.constant 0 : i32
    return %1, %c0_i32_1 : i32, i32
  }
  func.func @transform_3(%arg0: i32, %arg1: i32) -> (i32, i32) {
    %c0_i32 = arith.constant 0 : i32
    %c0_i32_0 = arith.constant 0 : i32
    %c0_i32_1 = arith.constant 0 : i32
    return %c0_i32, %c0_i32_0 : i32, i32
  }
  func.func @transform_4(%arg0: i32, %arg1: i32) -> (i32, i32) {
    %c0_i32 = arith.constant 0 : i32
    %c0_i32_0 = arith.constant 0 : i32
    %c0_i32_1 = arith.constant 0 : i32
    return %c0_i32, %c0_i32_0 : i32, i32
  }
  func.func @transform_5(%arg0: i32, %arg1: i32) -> (i32, i32) {
    %c0_i32 = arith.constant 0 : i32
    %c0_i32_0 = arith.constant 0 : i32
    %c0_i32_1 = arith.constant 0 : i32
    return %c0_i32, %c0_i32_0 : i32, i32
  }
  func.func @transform_6(%arg0: i32, %arg1: i32) -> (i32, i32) {
    %c1_i32 = arith.constant 1 : i32
    %0 = arith.cmpi eq, %arg0, %c1_i32 : i32
    %c0_i32 = arith.constant 0 : i32
    %1 = arith.select %0, %arg1, %c0_i32 : i32
    %c0_i32_0 = arith.constant 0 : i32
    %c0_i32_1 = arith.constant 0 : i32
    return %1, %c0_i32_0 : i32, i32
  }
  func.func @transform_7(%arg0: i32, %arg1: i32) -> (i32, i32) {
    %c2_i32 = arith.constant 2 : i32
    %0 = arith.cmpi eq, %arg0, %c2_i32 : i32
    %c0_i32 = arith.constant 0 : i32
    %1 = arith.select %0, %arg1, %c0_i32 : i32
    %c0_i32_0 = arith.constant 0 : i32
    %c0_i32_1 = arith.constant 0 : i32
    return %1, %c0_i32_0 : i32, i32
  }
}

</mosaic_0001>

<bundles_post_ra>
// kernel: tpu_custom_call.1
= control target key start
LH: loop header
LB: loop body
LE: loop exit
PB: predicated region body
PF: predicated region fallthrough
CT: control target
= control target key end

     0   :  { %12 = vsyncpa [#allocation10], 0  ;;  %s1235_s0 = inlined_call_operand.vmem [shape: f32[2], index: 0, kind: input, shape index: {}]   ;;  %s1236_s1 = inlined_call_operand.vmem [shape: f32[2], index: 1, kind: input, shape index: {}]   ;;  %s1237_s2 = inlined_call_operand.vmem [shape: f32[8,256], index: 2, kind: input, shape index: {}]   ;;  %s1238_s3 = inlined_call_operand.hbm [shape: f32[256,128], index: 3, kind: input, shape index: {}]   ;;  %s1239_s4 = inlined_call_operand.vmem [shape: f32[128,64], index: 4, kind: input, shape index: {}]   ;;  %s1240_s5 = inlined_call_operand.vmem [shape: f32[1,64], index: 5, kind: input, shape index: {}]   ;;  %s1241_s6 = inlined_call_operand.vmem [shape: f32[8,64], index: 6, kind: input, shape index: {}]   ;;  %s1242_s7 = inlined_call_operand.hbm [shape: f32[8,64], index: 7, kind: output, shape index: {}]  }
   0x1   :  { %13 = vsyncpa [#allocation12], 0 }
   0x2   :  { %14 = vsyncpa [#allocation8], 0 }
   0x3   :  { %15 = vsyncpa [#allocation9], 0 }
   0x4   :  { %17 = vsyncpa [#allocation9 + $0x1], 0  ;;  %s1080_s24 = smov 0   ;;  %s1082_s25 = smov 0  }
   0x5   :  { %s1084_s26 = smov 0  }
   0x6 LB: > { %s799_s27 = sadd.s32 4294967295, %s1030_s26   ;;  %s800_s28 = sadd.s32 4294967294, %s1030_s26   ;;  %s1030_s26 = sphi %s1084_s26, %s23_s26   ;;  %s1026_s25 = sphi %s1082_s25, %s1246_s25   ;;  %s1022_s24 = sphi %s1080_s24, %s1245_s24  }
   0x7   : > { %s35_s29 = sadd.s32 1, %s1026_s25  ;;  %p801_p0 = scmp.ge.s32.totalorder %s1030_s26, 1 }
   0x8   : > { %p37_p1 = scmp.ge.s32.totalorder %s35_s29, 3  ;;  %p235_p2 = scmp.lt.s32.totalorder %s1030_s26, 4 }
   0x9   : > { %p1102_p3 = scmp.eq.s32.totalorder %s799_s27, 0  ;;  %s247_s11 = sshll.u32 %s1235_s0, 4  ;;  %s248_s11 = int_to_ptr.vmem [resolvable:$true] %s247_s11 }
   0xa   : > { %s1248_s29 = smov (%p37_p1, %s35_s29), 0  ;;  %p1108_p4 = pnand %p801_p0, %p235_p2 }
   0xb   : > { %s257_s14 = sshll.u32 %s1236_s1, 4  ;;  %s266_s17 = sshll.u32 %s1238_s3, 4  ;;  %s258_s14 = int_to_ptr.vmem [resolvable:$true] %s257_s14  ;;  %s267_s17 = int_to_ptr.hbm [resolvable:$true] %s266_s17 }
   0xc   : > { %p838_p5 = pneg %p1108_p4  ;;  %s1032_s18 = smov [#allocation13]  }
   0xd   : > { %s268_s19 = sshll.u32 %s1032_s18, 4  ;;  %s1033_s20 = smov [#allocation7]   ;;  %s269_s19 = int_to_ptr.vmem [resolvable:$true] %s268_s19 }
   0xe   : > { %p839_p6 = pnand %p1102_p3, %p838_p5  ;;  %s1034_s21 = smov [#allocation11]  }
   0xf   : > { %s1035_s22 = smov 128   ;;  %s1036_s23 = smov 8  }
  0x10   : > { %841 = dma.vmem_to_smem (!%p839_p6), %s248_s11, 16, %s1033_s20, [#allocation10]  }
  0x11   : > { %844 = dma.vmem_to_smem (!%p839_p6), %s258_s14, 16, %s1034_s21, [#allocation12]  }
  0x12   : > { %847 = dma.hbm_to_vmem [thread:$0]  (!%p839_p6), %s267_s17, 4096, %s269_s19, [#allocation8], %s1035_s22, %s1035_s22, %s1036_s23  }
  0x13   : > { %313 = sbr.rel (%p1108_p4) target bundleno = 703 (0x2bf), region = 48 }
  0x18   : > { %1005 = dma.done.wait (%p1102_p3), [#allocation10], 16  }
  0x19   : > { %1007 = vsyncadd (%p1102_p3), [#allocation10], 4294967280 }
  0x1a   : > { %1009 = dma.done.wait (%p1102_p3), [#allocation12], 16  }
  0x1b   : > { %1011 = vsyncadd (%p1102_p3), [#allocation12], 4294967280 }
  0x1c   : > { %1013 = dma.done.wait (%p1102_p3), [#allocation8], 4096  }
  0x1d   : > { %1015 = vsyncadd (%p1102_p3), [#allocation8], 4294963200 }
  0x1e   : > { %330 = sfence }
  0x1f   : > { %p812_p7 = scmp.ne.s32.totalorder %s1022_s24, 0 }
  0x21   : > { %387 = sbr.rel (%p812_p7) target bundleno = 216 (0xd8), region = 64 }
  0x26   : > { %v405_v0 = vld [vmem:[#allocation13 + $0x78] sm:$0xff]  ;;  %v404_v2 = vld [vmem:[#allocation13 + $0x70] sm:$0xff]  ;;  %v403_v4 = vld [vmem:[#allocation13 + $0x68] sm:$0xff]  ;;  %v1037_v34 = vmov 0.0  }
  0x27   : > { %v421_v1 = vld [vmem:[#allocation13 + $0xf8] sm:$0xff]  ;;  %422 = vmatpush.msra.mxu0 %v405_v0  ;;  %v420_v3 = vld [vmem:[#allocation13 + $0xf0] sm:$0xff]  ;;  %v419_v5 = vld [vmem:[#allocation13 + $0xe8] sm:$0xff]  ;;  %469 = vst [vmem:[#allocation4] sm:$0x3] %v1037_v34 }
  0x28   : > { %442 = vmatpush.msra.mxu1 %v421_v1  ;;  %v402_v6 = vld [vmem:[#allocation13 + $0x60] sm:$0xff]  ;;  %v401_v8 = vld [vmem:[#allocation13 + $0x58] sm:$0xff]  ;;  %v400_v10 = vld [vmem:[#allocation13 + $0x50] sm:$0xff] }
  0x29   : > { %423 = vmatpush.msra.mxu0 %v404_v2  ;;  %v418_v7 = vld [vmem:[#allocation13 + $0xe0] sm:$0xff]  ;;  %v417_v9 = vld [vmem:[#allocation13 + $0xd8] sm:$0xff]  ;;  %v416_v11 = vld [vmem:[#allocation13 + $0xd0] sm:$0xff] }
  0x2a   : > { %443 = vmatpush.msra.mxu1 %v420_v3  ;;  %v399_v12 = vld [vmem:[#allocation13 + $0x48] sm:$0xff]  ;;  %v398_v14 = vld [vmem:[#allocation13 + $0x40] sm:$0xff]  ;;  %v397_v16 = vld [vmem:[#allocation13 + $0x38] sm:$0xff] }
  0x2b   : > { %424 = vmatpush.msra.mxu0 %v403_v4  ;;  %v415_v13 = vld [vmem:[#allocation13 + $0xc8] sm:$0xff]  ;;  %v414_v15 = vld [vmem:[#allocation13 + $0xc0] sm:$0xff]  ;;  %v413_v17 = vld [vmem:[#allocation13 + $0xb8] sm:$0xff] }
  0x2c   : > { %444 = vmatpush.msra.mxu1 %v419_v5  ;;  %v396_v18 = vld [vmem:[#allocation13 + $0x30] sm:$0xff]  ;;  %v395_v20 = vld [vmem:[#allocation13 + $0x28] sm:$0xff]  ;;  %v394_v22 = vld [vmem:[#allocation13 + $0x20] sm:$0xff] }
  0x2d   : > { %425 = vmatpush.msra.mxu0 %v402_v6  ;;  %v412_v19 = vld [vmem:[#allocation13 + $0xb0] sm:$0xff]  ;;  %v411_v21 = vld [vmem:[#allocation13 + $0xa8] sm:$0xff]  ;;  %v410_v23 = vld [vmem:[#allocation13 + $0xa0] sm:$0xff] }
  0x2e   : > { %445 = vmatpush.msra.mxu1 %v418_v7  ;;  %v393_v24 = vld [vmem:[#allocation13 + $0x18] sm:$0xff]  ;;  %v392_v26 = vld [vmem:[#allocation13 + $0x10] sm:$0xff]  ;;  %v391_v28 = vld [vmem:[#allocation13 + $0x8] sm:$0xff] }
  0x2f   : > { %426 = vmatpush.msra.mxu0 %v401_v8  ;;  %v409_v25 = vld [vmem:[#allocation13 + $0x98] sm:$0xff]  ;;  %v408_v27 = vld [vmem:[#allocation13 + $0x90] sm:$0xff]  ;;  %v407_v29 = vld [vmem:[#allocation13 + $0x88] sm:$0xff] }
  0x30   : > { %446 = vmatpush.msra.mxu1 %v417_v9  ;;  %v390_v30 = vld [vmem:[#allocation13] sm:$0xff]  ;;  %v388_v32 = vld [vmem:[%s1237_s2] sm:$0xff]  ;;  %v389_v33 = vld [vmem:[%s1237_s2 + $0x8] sm:$0xff] }
  0x31   : > { %427 = vmatpush.msra.mxu0 %v400_v10  ;;  %v406_v31 = vld [vmem:[#allocation13 + $0x80] sm:$0xff]  ;;  %v470_v48 = vld [vmem:[#allocation4] sm:$0x1]  ;;  %v479_v51 = vld [vmem:[#allocation4 + $0x1] sm:$0x1] }
  0x32   : > { %447 = vmatpush.msra.mxu1 %v416_v11 }
  0x33   : > { %428 = vmatpush.msra.mxu0 %v399_v12 }
  0x34   : > { %448 = vmatpush.msra.mxu1 %v415_v13 }
  0x35   : > { %429 = vmatpush.msra.mxu0 %v398_v14 }
  0x36   : > { %449 = vmatpush.msra.mxu1 %v414_v15 }
  0x37   : > { %430 = vmatpush.msra.mxu0 %v397_v16 }
  0x38   : > { %450 = vmatpush.msra.mxu1 %v413_v17 }
  0x39   : > { %431 = vmatpush.msra.mxu0 %v396_v18 }
  0x3a   : > { %451 = vmatpush.msra.mxu1 %v412_v19 }
  0x3b   : > { %432 = vmatpush.msra.mxu0 %v395_v20 }
  0x3c   : > { %452 = vmatpush.msra.mxu1 %v411_v21 }
  0x3d   : > { %433 = vmatpush.msra.mxu0 %v394_v22 }
  0x3e   : > { %453 = vmatpush.msra.mxu1 %v410_v23 }
  0x3f   : > { %434 = vmatpush.msra.mxu0 %v393_v24 }
  0x40   : > { %454 = vmatpush.msra.mxu1 %v409_v25 }
  0x41   : > { %435 = vmatpush.msra.mxu0 %v392_v26 }
  0x42   : > { %455 = vmatpush.msra.mxu1 %v408_v27 }
  0x43   : > { %436 = vmatpush.msra.mxu0 %v391_v28 }
  0x44   : > { %456 = vmatpush.msra.mxu1 %v407_v29 }
  0x45   : > { %437 = vmatpush.msra.mxu0 %v390_v30 }
  0x46   : > { %457 = vmatpush.msra.mxu1 %v406_v31  ;;  %438 = vmatmul.f32.vlgmr.msra.gmra.mxu0 %v388_v32 }
  0x47   : > { %458 = vmatmul.f32.vlgmr.msra.gmra.mxu1 %v389_v33 }
  0xc3   : > { %v439_v35 = vpop.f32.mrf.mxu0 }
  0xc4   : > { %v459_v36 = vpop.f32.mrf.mxu1 }
  0xc5   : > { %v460_v37 = vadd.f32 %v459_v36, %v439_v35 }
  0xc7   : > { %464 = vst [vmem:[#allocation2] sm:$0xff] %v460_v37  ;;  %v471_v38 = vrot.slane %v460_v37, 4  ;;  %v480_v39 = vmul.f32 %v460_v37, %v460_v37 }
  0xc9   : > { %v472_v40 = vadd.f32 %v471_v38, %v460_v37  ;;  %v481_v41 = vrot.slane %v480_v39, 4 }
  0xcb   : > { %v473_v42 = vrot.slane %v472_v40, 2  ;;  %v482_v43 = vadd.f32 %v481_v41, %v480_v39 }
  0xcd   : > { %v474_v44 = vadd.f32 %v473_v42, %v472_v40  ;;  %v483_v45 = vrot.slane %v482_v43, 2 }
  0xcf   : > { %v475_v46 = vrot.slane %v474_v44, 1  ;;  %v484_v47 = vadd.f32 %v483_v45, %v482_v43 }
  0xd1   : > { %v476_v49 = vadd.f32 %v475_v46, %v474_v44  ;;  %v485_v50 = vrot.slane %v484_v47, 1 }
  0xd3   : > { %v477_v52 = vadd.f32 %v476_v49, %v470_v48  ;;  %v486_v53 = vadd.f32 %v485_v50, %v484_v47 }
  0xd5   : > { %478 = vst [vmem:[#allocation4] sm:$0x1] %v477_v52  ;;  %v487_v54 = vadd.f32 %v486_v53, %v479_v51 }
  0xd7   : > { %488 = vst [vmem:[#allocation4 + $0x1] sm:$0x1] %v487_v54 }
  0xd8 PF: > { %p813_p8 = scmp.ne.s32.totalorder %s1022_s24, 1 }
  0xd9   : > { %s530_s9 = sld [smem:[#allocation7]] (!%p813_p8) }
  0xda   : > { %492 = sbr.rel (%p813_p8) target bundleno = 556 (0x22c), region = 72  ;;  %s815_s10 = sld [smem:[#allocation7 + $0x1]] (!%p813_p8) }
  0xdb   : > { %s558_s11 = sld [smem:[#allocation11]] (!%p813_p8) }
  0xdc   : > { %s816_s12 = sld [smem:[#allocation11 + $0x1]] (!%p813_p8) }
  0xdf   : > { %v497_v55 = vlaneseq  ;;  %vm570_vm0 = vcmask 516096   ;;  %v1038_v56 = vmov 0.0   ;;  %v503_v58 = vld [vmem:[#allocation4] sm:$0x1]  ;;  %v504_v59 = vld [vmem:[#allocation4 + $0x1] sm:$0x1]  ;;  %v542_v45 = vstv %s530_s9 }
  0xe0   : > { %571 = vst.msk [vmem:[#allocation6] sm:$0x1] %vm570_vm0, %v1038_v56  ;;  %vm506_vm2 = vcmask 1040384   ;;  %v597_v6 = vld [vmem:[%s1239_s4 + $0x78] sm:$0xff]  ;;  %v596_v7 = vld [vmem:[%s1239_s4 + $0x70] sm:$0xff]  ;;  %v595_v8 = vld [vmem:[%s1239_s4 + $0x68] sm:$0xff]  ;;  %v556_v50 = vstv %s815_s10 }
  0xe1   : > { %v1148_v57 = vand.u32 127, %v497_v55  ;;  %602 = vmatpush.msra.mxu0 %v597_v6  ;;  %v594_v9 = vld [vmem:[%s1239_s4 + $0x60] sm:$0xff]  ;;  %v593_v10 = vld [vmem:[%s1239_s4 + $0x58] sm:$0xff]  ;;  %v592_v15 = vld [vmem:[%s1239_s4 + $0x50] sm:$0xff]  ;;  %v560_v55 = vstv %s558_s11  ;;  %vm627_vm9 = vcmask 523264  }
  0xe2   : > { %v591_v17 = vld [vmem:[%s1239_s4 + $0x48] sm:$0xff]  ;;  %v590_v19 = vld [vmem:[%s1239_s4 + $0x40] sm:$0xff]  ;;  %v589_v21 = vld [vmem:[%s1239_s4 + $0x38] sm:$0xff] }
  0xe3   : > { %vm499_vm1 = vcmp.lt.s32.totalorder %v1148_v57, 64  ;;  %603 = vmatpush.msra.mxu0 %v596_v7  ;;  %v588_v26 = vld [vmem:[%s1239_s4 + $0x30] sm:$0xff]  ;;  %v587_v27 = vld [vmem:[%s1239_s4 + $0x28] sm:$0xff]  ;;  %v586_v29 = vld [vmem:[%s1239_s4 + $0x20] sm:$0xff] }
  0xe4   : > { %v814_v60 = vsel %vm499_vm1, 1.0, %v1038_v56  ;;  %v585_v31 = vld [vmem:[%s1239_s4 + $0x18] sm:$0xff]  ;;  %v584_v34 = vld [vmem:[%s1239_s4 + $0x10] sm:$0xff]  ;;  %v583_v36 = vld [vmem:[%s1239_s4 + $0x8] sm:$0xff]  ;;  %v564_v56 = vstv %s816_s12 }
  0xe5   : > { %v505_v61 = vmul.f32 %v814_v60, %v503_v58  ;;  %v514_v62 = vmul.f32 %v814_v60, %v504_v59  ;;  %v502_v63 = vsub.f32 1.0, %v814_v60  ;;  %604 = vmatpush.msra.mxu0 %v595_v8  ;;  %v582_v38 = vld [vmem:[%s1239_s4] sm:$0xff] }
  0xe6   : > { %v624_v57 = vld [vmem:[%s1241_s6] sm:$0xff] }
  0xe7   : > { %v507_v0 = vsel %vm506_vm2, %v505_v61, 0.0  ;;  %v515_v1 = vsel %vm506_vm2, %v514_v62, 0.0  ;;  %v510_v2 = vmul.f32 %v503_v58, %v502_v63  ;;  %v518_v3 = vmul.f32 %v504_v59, %v502_v63  ;;  %605 = vmatpush.msra.mxu0 %v594_v9 }
  0xe8   : > { %508 = vadd.xlane.f32.xlu0 %v507_v0  ;;  %516 = vadd.xlane.f32.xlu1 %v515_v1  ;;  %v574_v0 = vld [vmem:[#allocation2] sm:$0xff] }
  0xe9   : > { %v511_v4 = vsel %vm506_vm2, %v510_v2, 0.0  ;;  %v519_v5 = vsel %vm506_vm2, %v518_v3, 0.0  ;;  %606 = vmatpush.msra.mxu0 %v593_v10 }
  0xeb   : > { %607 = vmatpush.msra.mxu0 %v592_v15 }
  0xed   : > { %608 = vmatpush.msra.mxu0 %v591_v17  ;;  %v629_v17 = vld [vmem:[#allocation6] sm:$0x1] }
  0xef   : > { %609 = vmatpush.msra.mxu0 %v590_v19 }
  0xf0   : > { %512 = vadd.xlane.f32.xlu0 %v511_v4  ;;  %520 = vadd.xlane.f32.xlu1 %v519_v5  ;;  %v895_v5 = vld [vmem:[%s1240_s5] ss:$0 sm:$0xff] }
  0xf1   : > { %610 = vmatpush.msra.mxu0 %v589_v21 }
  0xf3   : > { %611 = vmatpush.msra.mxu0 %v588_v26 }
  0xf5   : > { %612 = vmatpush.msra.mxu0 %v587_v27 }
  0xf7   : > { %613 = vmatpush.msra.mxu0 %v586_v29 }
  0xf9   : > { %614 = vmatpush.msra.mxu0 %v585_v31 }
  0xfb   : > { %615 = vmatpush.msra.mxu0 %v584_v34 }
  0xfd   : > { %616 = vmatpush.msra.mxu0 %v583_v36 }
  0xff   : > { %617 = vmatpush.msra.mxu0 %v582_v38 }
 0x15b   : > { %v509_v11 = vpop.xlane.xlu0 %508  ;;  %v517_v12 = vpop.xlane.xlu1 %516 }
 0x15c   : > { %v1168_v13 = vmul.f32 0.0078125, %v509_v11  ;;  %v524_v14 = vmul.f32 0.0078125, %v517_v12 }
 0x15e   : > { %v525_v16 = vmul.f32 %v1168_v13, %v1168_v13 }
 0x160   : > { %v526_v18 = vsub.f32 %v524_v14, %v525_v16 }
 0x162   : > { %v531_v20 = vadd.f32 1e-05, %v526_v18 }
 0x163   : > { %v513_v22 = vpop.xlane.xlu0 %512  ;;  %v521_v23 = vpop.xlane.xlu1 %520 }
 0x164   : > { %896 = vrsqrt.f32 %v531_v20  ;;  %v523_v24 = vmul.f32 0.0078125, %v513_v22  ;;  %v527_v25 = vmul.f32 0.0078125, %v521_v23  ;;  %vm538_vm4 = vweird.f32 %v531_v20 }
 0x166   : > { %v528_v28 = vmul.f32 %v523_v24, %v523_v24 }
 0x168   : > { %v529_v30 = vsub.f32 %v527_v25, %v528_v28 }
 0x16a   : > { %v897_v32 = vpop.eup %896  ;;  %v545_v33 = vadd.f32 1e-05, %v529_v30 }
 0x16b   : > { %v533_v35 = vmul.f32 %v897_v32, %v531_v20  ;;  %vm539_vm3 = vweird.f32 %v897_v32 }
 0x16c   : > { %898 = vrsqrt.f32 %v545_v33  ;;  %vm540_vm5 = vmor %vm538_vm4, %vm539_vm3  ;;  %vm552_vm7 = vweird.f32 %v545_v33 }
 0x16d   : > { %v534_v37 = vmul.f32 %v897_v32, %v533_v35 }
 0x16f   : > { %v535_v39 = vmul.f32 0.5, %v534_v37 }
 0x171   : > { %v536_v40 = vsub.f32 1.5, %v535_v39 }
 0x172   : > { %v899_v41 = vpop.eup %898 }
 0x173   : > { %v537_v42 = vmul.f32 %v897_v32, %v536_v40  ;;  %v547_v43 = vmul.f32 %v899_v41, %v545_v33  ;;  %vm553_vm6 = vweird.f32 %v899_v41 }
 0x174   : > { %vm554_vm8 = vmor %vm552_vm7, %vm553_vm6 }
 0x175   : > { %v548_v44 = vmul.f32 %v899_v41, %v547_v43  ;;  %v541_v46 = vsel %vm540_vm5, %v897_v32, %v537_v42 }
 0x176   : > { %v543_v49 = vmul.f32 %v542_v45, %v541_v46 }
 0x177   : > { %v549_v47 = vmul.f32 0.5, %v548_v44 }
 0x178   : > { %v559_v53 = vmul.f32 %v543_v49, %v1168_v13 }
 0x179   : > { %v550_v48 = vsub.f32 1.5, %v549_v47 }
 0x17a   : > { %v561_v60 = vsub.f32 %v560_v55, %v559_v53 }
 0x17b   : > { %v551_v51 = vmul.f32 %v899_v41, %v550_v48 }
 0x17d   : > { %v555_v52 = vsel %vm554_vm8, %v899_v41, %v551_v51 }
 0x17e   : > { %v557_v54 = vmul.f32 %v556_v50, %v555_v52 }
 0x180   : > { %v563_v58 = vmul.f32 %v557_v54, %v523_v24  ;;  %v566_v59 = vsel %vm499_vm1, %v543_v49, %v557_v54 }
 0x181   : > { %567 = vst [vmem:[#allocation5] sm:$0x1] %v566_v59 }
 0x182   : > { %v565_v61 = vsub.f32 %v564_v56, %v563_v58 }
 0x184   : > { %v568_v62 = vsel %vm499_vm1, %v561_v60, %v565_v61 }
 0x185   : > { %569 = vst [vmem:[#allocation5 + $0x1] sm:$0x1] %v568_v62 }
 0x188   : > { %v893_v63 = vld [vmem:[#allocation5] ss:$0 sm:$0xff] }
 0x189   : > { %v577_v1 = vmul.f32 %v893_v63, %v574_v0 }
 0x18c   : > { %v894_v2 = vld [vmem:[#allocation5 + $0x1] ss:$0 sm:$0xff] }
 0x18d   : > { %v580_v3 = vadd.f32 %v894_v2, %v577_v1 }
 0x18f   : > { %v581_v4 = vmax.f32 %v580_v3, 0.0 }
 0x191   : > { %618 = vmatmul.f32.vlgmr.msra.gmra.mxu0 %v581_v4 }
 0x20e   : > { %v619_v6 = vpop.f32.mrf.mxu0 }
 0x20f   : > { %v620_v7 = vadd.f32 %v895_v5, %v619_v6 }
 0x211   : > { %v622_v8 = vmul.f32 1.442695, %v620_v7 }
 0x213   : > { %900 = vpow2.f32 %v622_v8 }
 0x219   : > { %v901_v9 = vpop.eup %900 }
 0x21a   : > { %v625_v10 = vmul.f32 %v901_v9, %v624_v57 }
 0x21c   : > { %628 = vst.msk [vmem:[#allocation3] sm:$0xff] %vm627_vm9, %v625_v10  ;;  %v630_v11 = vsel %vm627_vm9, %v625_v10, 0.0 }
 0x21d   : > { %v631_v12 = vrot.slane %v630_v11, 4 }
 0x21f   : > { %v632_v13 = vadd.f32 %v631_v12, %v630_v11 }
 0x221   : > { %v633_v14 = vrot.slane %v632_v13, 2 }
 0x223   : > { %v634_v15 = vadd.f32 %v633_v14, %v632_v13 }
 0x225   : > { %v635_v16 = vrot.slane %v634_v15, 1 }
 0x227   : > { %v636_v18 = vadd.f32 %v635_v16, %v634_v15 }
 0x229   : > { %v637_v19 = vadd.f32 %v636_v18, %v629_v17 }
 0x22b   : > { %639 = vst.msk [vmem:[#allocation6] sm:$0x1] %vm570_vm0, %v637_v19 }
 0x22c PF: > { %p817_p9 = scmp.ne.s32.totalorder %s1022_s24, 2 }
 0x22e   : > { %643 = sbr.rel (%p817_p9) target bundleno = 699 (0x2bb), region = 80 }
 0x233   : > { %v644_v20 = vld [vmem:[#allocation6] sm:$0x1]  ;;  %vm645_vm10 = vcmask 516096   ;;  %v655_v27 = vld [vmem:[#allocation3] sm:$0xff]  ;;  %vm658_vm11 = vcmask 523264  }
 0x234   : > { %v646_v21 = vsel %vm645_vm10, %v644_v20, 0.0 }
 0x235   : > { %647 = vadd.xlane.f32.xlu0 %v646_v21 }
 0x2a8   : > { %v648_v22 = vpop.xlane.xlu0 %647 }
 0x2a9   : > { %902 = vrcp.f32 %v648_v22 }
 0x2af   : > { %v903_v23 = vpop.eup %902 }
 0x2b0   : > { %v650_v24 = vmul.f32 %v903_v23, %v648_v22 }
 0x2b2   : > { %v651_v25 = vsub.f32 2.0, %v650_v24 }
 0x2b4   : > { %v652_v26 = vmul.f32 %v903_v23, %v651_v25 }
 0x2b6   : > { %v656_v28 = vperm.slane %v652_v26, 0 }
 0x2b8   : > { %v657_v29 = vmul.f32 %v656_v28, %v655_v27 }
 0x2ba   : > { %659 = vst.msk [vmem:[#allocation14] sm:$0xff] %vm658_vm11, %v657_v29 }
 0x2bb PF: > { %p858_p10 = scmp.eq.s32.totalorder %s799_s27, 2  ;;  %s677_s18 = sshll.u32 %s1242_s7, 4  ;;  %s678_s18 = int_to_ptr.hbm [resolvable:$true] %s677_s18 }
 0x2bc   : > { %s1039_s19 = smov [#allocation14]  }
 0x2bd   : > { %s675_s20 = sshll.u32 %s1039_s19, 4  ;;  %s676_s20 = int_to_ptr.vmem [resolvable:$true] %s675_s20 }
 0x2be   : > { %835 = dma.vmem_to_hbm [thread:$0]  (%p858_p10), %s676_s20, 128, %s678_s18, [#allocation9]  }
 0x2bf PF: > { %p859_p11 = scmp.ge.s32.totalorder %s1030_s26, 2  ;;  %p860_p12 = scmp.eq.s32.totalorder %s800_s28, 2 }
 0x2c1   : > { %p849_p13 = pnand %p860_p12, %p859_p11 }
 0x2c3   : > { %p850_p0 = pneg %p849_p13 }
 0x2c5   : > { %1017 = dma.done.wait (%p850_p0), [#allocation9], 128  }
 0x2c6   : > { %1019 = vsyncadd (%p850_p0), [#allocation9], 4294967168  ;;  %s23_s26 = sadd.s32 1, %s1030_s26   ;;  %s1245_s24 = smov %s1026_s25 }
 0x2c7   : > { %p20_p1 = scmp.ge.s32.totalorder %s23_s26, 5   ;;  %s1246_s25 = smov %s1248_s29 }
 0x2c9   :  { %22 = sbr.rel (!%p20_p1) target bundleno = 6 (0x6), region = 124 }
 0x2ce   :  { %696 = vsyncpa [#allocation8], 1 }
 0x2cf   :  { %698 = vsyncpa [#allocation8 + $0x1], 1 }
 0x2d0   :  { %699 = vsyncpa [#allocation9], 1 }
 0x2d1   :  { %701 = vsyncpa [#allocation9 + $0x1], 1 }
 0x2d2   :  { %702 = vsyncpa [#allocation10], 1 }
 0x2d3   :  { %704 = vsyncpa [#allocation10 + $0x1], 1 }
 0x2d4   :  { %705 = vsyncpa [#allocation12], 1 }

</bundles_post_ra>
